<compile_context>
chip_gen: v5e
topology: v5e:2x2
jax: 0.10.0
libtpu: 0.0.40
codegen_flags: <defaults>
</compile_context>

<pallas_src>
import functools

import jax
import jax.numpy as jnp
import numpy as np
from jax import lax
from jax.experimental import pallas as pl
from jax.experimental.pallas import tpu as pltpu


# ---------------------------------------------------------------------------
# Kernel: one batch element per "parallel" grid slot, all layers in-body.
# ---------------------------------------------------------------------------
def rollout_rows_kernel(x_ref, o_ref, *, alpha, row_a, row_b):
    """x_ref: (L, 1, S, S) layer stack of one batch element (native dtype).
    o_ref: (1, 8, S) f32.  Row 0 = CLS rollout row, row 1 = sum of the two
    modal-mixed rollout rows, rows 2..7 = 0 (sublane padding)."""
    L = x_ref.shape[0]
    S = x_ref.shape[2]

    # Thin row-selector init (built once on the VPU, no HBM identity operand):
    #   row 0 -> e_0 (CLS),  row 1 -> e_{row_a} + e_{row_b} (prompt rows pre-combined).
    r = lax.broadcasted_iota(jnp.int32, (8, S), 0)
    c = lax.broadcasted_iota(jnp.int32, (8, S), 1)
    init = ((r == 0) & (c == 0)) | ((r == 1) & ((c == row_a) | (c == row_b)))
    acc0 = init.astype(jnp.float32)

    # Reverse-order chain:  R <- R @ (alpha*A_l + (1-alpha)I)  for l = L-1 .. 0,
    # with alpha folded algebraically so no eye / a_prime tiles are built per step.
    def body(t, acc):
        a = x_ref[L - 1 - t, 0]                       # (S, S), native dtype
        prod = jnp.dot(acc.astype(a.dtype), a,        # bf16 operands if x is bf16
                       preferred_element_type=jnp.float32)
        return alpha * prod + (1.0 - alpha) * acc     # f32 carry

    acc = lax.fori_loop(0, L, body, acc0, unroll=True)

    o_ref[0] = acc                                    # single sublane-aligned (8,S) store


# ---------------------------------------------------------------------------
# Forward wrapper (matches Part_Attention.forward semantics)
# ---------------------------------------------------------------------------
def part_attention_forward(x, modal, *, ratio=0.5, token_select_type='all',
                           alpha=0.5, return_scores=False):
    """x: (L, B, S, S) stack of attention maps (PyTorch passes a list of (B,S,S)).
    Kept in its native dtype (no wrapper-side upcast copy)."""
    if isinstance(x, (list, tuple)):
        x = jnp.stack(x, axis=0)
    L, B, S, _ = x.shape
    N = S - 4

    # modal -> rows mixed for the "prompt" score (negative indices of the torch code)
    if modal == 0:
        row_a, row_b = S - 1, S - 2            # position_mix = [-1, -2]
    elif modal == 1:
        row_a, row_b = S - 1, S - 3            # [-1, -3]
    else:
        row_a, row_b = S - 2, S - 3            # [-2, -3]

    rows = pl.pallas_call(
        functools.partial(rollout_rows_kernel, alpha=float(alpha),
                          row_a=row_a, row_b=row_b),
        out_shape=jax.ShapeDtypeStruct((B, 8, S), jnp.float32),
        grid_spec=pltpu.PrefetchScalarGridSpec(
            num_scalar_prefetch=0,
            grid=(B,),                                         # B only: fewer grid steps,
            in_specs=[pl.BlockSpec((L, 1, S, S),               # one big DMA per batch elem
                                   lambda b: (0, b, 0, 0))],
            out_specs=pl.BlockSpec((1, 8, S), lambda b: (b, 0, 0))),
        compiler_params=pltpu.CompilerParams(
            dimension_semantics=("parallel",)),                # v7x: one batch per TC
    )(x)

    key_scores = rows[:, 0, 1:N + 1]        # (B, N) == last_map[:, 0, 1:129]
    prompt_scores = rows[:, 1, 1:N + 1]     # (B, N) == sum of the two modal rows, cols 1:129
    k = int(N * ratio)

    # --- glue: top-k + scatter mask (data-dependent; no clean Pallas op -> plain JAX) ---
    # TODO(synk): top-k + index scatter stays in XLA; it is O(B*N) and negligible here.
    def topk_mask(scores):
        vals, idx = lax.top_k(scores, k)                        # descending, like torch.topk
        mask = jnp.zeros((B, N), dtype=jnp.bool_)
        mask = mask.at[jnp.arange(B)[:, None], idx].set(True)
        return vals, mask

    _, mask_key = topk_mask(key_scores)
    vals_prompt, mask_prompt = topk_mask(prompt_scores)

    if token_select_type == 'all':
        max_index_set = mask_prompt | mask_key
    elif token_select_type == 'inner':
        max_index_set = mask_key
    elif token_select_type == 'cross':
        max_index_set = mask_prompt
    else:
        raise ValueError(f"unknown token_select_type: {token_select_type!r}")

    if return_scores:
        return vals_prompt, max_index_set, key_scores, prompt_scores
    # PyTorch returns (_, max_index_set) where `_` is the prompt top-k values.
    return vals_prompt, max_index_set


if __name__ == "__main__":
    L, B, S = 4, 2, 132            # module hardcodes 132 tokens (N = 128 patch tokens + 4)
    ratio, alpha, tsel = 0.5, 0.5, 'all'
    N = S - 4
    k = int(N * ratio)

    key = jax.random.PRNGKey(0)
    logits = jax.random.normal(key, (L, B, S, S), dtype=jnp.float32)
    # attention maps kept bf16 in HBM end-to-end (kernel consumes native dtype)
    x = jax.nn.softmax(logits, axis=-1).astype(jnp.bfloat16)

    vals, mask, key_sc, prompt_sc = part_attention_forward(
        x, modal=0, ratio=ratio, token_select_type=tsel, alpha=alpha, return_scores=True)
    vals, mask, key_sc, prompt_sc = jax.block_until_ready((vals, mask, key_sc, prompt_sc))

    # --- pure-JAX f32 reference on the same bf16 inputs (PyTorch association order) ---
    xf = x.astype(jnp.float32)
    eye = jnp.eye(S, dtype=jnp.float32)[None]
    last_map = xf[0] * alpha + eye * (1.0 - alpha)
    for i in range(1, L):
        last_map = jnp.matmul(xf[i] * alpha + eye * (1.0 - alpha), last_map,
                              precision=lax.Precision.HIGHEST)
    ref_key = last_map[:, 0, 1:N + 1]
    ref_prompt = last_map[:, S - 1, 1:N + 1] + last_map[:, S - 2, 1:N + 1]

    np.testing.assert_allclose(np.asarray(key_sc), np.asarray(ref_key),
                               rtol=3e-2, atol=3e-4)
    np.testing.assert_allclose(np.asarray(prompt_sc), np.asarray(ref_prompt),
                               rtol=3e-2, atol=3e-4)
    ref_vals, _ = lax.top_k(ref_prompt, k)
    np.testing.assert_allclose(np.asarray(vals), np.asarray(ref_vals),
                               rtol=3e-2, atol=3e-4)

    # modal=1 path (prompt rows [-1, -3])
    _, _, _, prompt_sc1 = part_attention_forward(
        x, modal=1, ratio=ratio, token_select_type='cross', alpha=alpha, return_scores=True)
    prompt_sc1 = jax.block_until_ready(prompt_sc1)
    ref_prompt1 = last_map[:, S - 1, 1:N + 1] + last_map[:, S - 3, 1:N + 1]
    np.testing.assert_allclose(np.asarray(prompt_sc1), np.asarray(ref_prompt1),
                               rtol=3e-2, atol=3e-4)

    assert vals.shape == (B, k) and vals.dtype == jnp.float32
    assert mask.shape == (B, N) and mask.dtype == jnp.bool_
    counts = np.asarray(jnp.sum(mask, axis=1))
    assert np.all(counts >= k) and np.all(counts <= min(2 * k, N))   # union of two k-sets
    assert bool(jnp.all(jnp.isfinite(vals)))
    print("KERNEL_OK")
</pallas_src>

<mosaic_0001>
module attributes {stable_mosaic.version = 11 : i64} {
  func.func @rollout_rows_kernel(%arg0: i32, %arg1: memref<4x1x132x132xbf16, #tpu.memory_space<vmem>>, %arg2: memref<1x8x132xf32, #tpu.memory_space<vmem>>) attributes {dimension_semantics = [#tpu.dimension_semantics<parallel>], iteration_bounds = array<i64: 2>, scalar_prefetch = 0 : i64, scratch_operands = 0 : i64, tpu.core_type = #tpu.core_type<tc>, window_params = [{transform_indices = @transform_0, window_bounds = array<i64: 4, 1, 132, 132>}, {transform_indices = @transform_1, window_bounds = array<i64: 1, 8, 132>}]} {
    %0 = tpu.iota {dimensions = array<i32: 0>} : vector<8x132xi32>
    %1 = tpu.iota {dimensions = array<i32: 1>} : vector<8x132xi32>
    %c0_i32 = arith.constant 0 : i32
    %2 = vector.broadcast %c0_i32 : i32 to vector<8x132xi32>
    %3 = arith.cmpi eq, %0, %2 : vector<8x132xi32>
    %c0_i32_0 = arith.constant 0 : i32
    %4 = vector.broadcast %c0_i32_0 : i32 to vector<8x132xi32>
    %5 = arith.cmpi eq, %1, %4 : vector<8x132xi32>
    %6 = arith.andi %3, %5 : vector<8x132xi1>
    %c1_i32 = arith.constant 1 : i32
    %7 = vector.broadcast %c1_i32 : i32 to vector<8x132xi32>
    %8 = arith.cmpi eq, %0, %7 : vector<8x132xi32>
    %c131_i32 = arith.constant 131 : i32
    %9 = vector.broadcast %c131_i32 : i32 to vector<8x132xi32>
    %10 = arith.cmpi eq, %1, %9 : vector<8x132xi32>
    %c130_i32 = arith.constant 130 : i32
    %11 = vector.broadcast %c130_i32 : i32 to vector<8x132xi32>
    %12 = arith.cmpi eq, %1, %11 : vector<8x132xi32>
    %13 = arith.ori %10, %12 : vector<8x132xi1>
    %14 = arith.andi %8, %13 : vector<8x132xi1>
    %15 = arith.ori %6, %14 : vector<8x132xi1>
    %16 = arith.extui %15 : vector<8x132xi1> to vector<8x132xi32>
    %17 = arith.sitofp %16 : vector<8x132xi32> to vector<8x132xf32>
    %c0_i32_1 = arith.constant 0 : i32
    %c3_i32 = arith.constant 3 : i32
    %18 = arith.subi %c3_i32, %c0_i32_1 : i32
    %19 = arith.index_cast %18 : i32 to index
    %c0 = arith.constant 0 : index
    %c0_2 = arith.constant 0 : index
    %c0_3 = arith.constant 0 : index
    %20 = vector.load %arg1[%19, %c0, %c0_2, %c0_3] : memref<4x1x132x132xbf16, #tpu.memory_space<vmem>>, vector<1x1x132x132xbf16>
    %21 = vector.shape_cast %20 : vector<1x1x132x132xbf16> to vector<132x132xbf16>
    %22 = arith.truncf %17 : vector<8x132xf32> to vector<8x132xbf16>
    %cst = arith.constant dense<0.000000e+00> : vector<8x132xf32>
    %23 = tpu.matmul %22, %21, %cst {dimension_numbers = #tpu.dot_dimension_numbers<[1], [0], [0], [1], [0, 0, 1, 1], [], []>} : vector<8x132xbf16>, vector<132x132xbf16>, vector<8x132xf32> -> vector<8x132xf32>
    %cst_4 = arith.constant 5.000000e-01 : f32
    %24 = vector.broadcast %cst_4 : f32 to vector<8x132xf32>
    %25 = arith.mulf %24, %23 : vector<8x132xf32>
    %cst_5 = arith.constant 5.000000e-01 : f32
    %26 = vector.broadcast %cst_5 : f32 to vector<8x132xf32>
    %27 = arith.mulf %26, %17 : vector<8x132xf32>
    %28 = arith.addf %25, %27 : vector<8x132xf32>
    %c1_i32_6 = arith.constant 1 : i32
    %c3_i32_7 = arith.constant 3 : i32
    %29 = arith.subi %c3_i32_7, %c1_i32_6 : i32
    %30 = arith.index_cast %29 : i32 to index
    %c0_8 = arith.constant 0 : index
    %c0_9 = arith.constant 0 : index
    %c0_10 = arith.constant 0 : index
    %31 = vector.load %arg1[%30, %c0_8, %c0_9, %c0_10] : memref<4x1x132x132xbf16, #tpu.memory_space<vmem>>, vector<1x1x132x132xbf16>
    %32 = vector.shape_cast %31 : vector<1x1x132x132xbf16> to vector<132x132xbf16>
    %33 = arith.truncf %28 : vector<8x132xf32> to vector<8x132xbf16>
    %cst_11 = arith.constant dense<0.000000e+00> : vector<8x132xf32>
    %34 = tpu.matmul %33, %32, %cst_11 {dimension_numbers = #tpu.dot_dimension_numbers<[1], [0], [0], [1], [0, 0, 1, 1], [], []>} : vector<8x132xbf16>, vector<132x132xbf16>, vector<8x132xf32> -> vector<8x132xf32>
    %cst_12 = arith.constant 5.000000e-01 : f32
    %35 = vector.broadcast %cst_12 : f32 to vector<8x132xf32>
    %36 = arith.mulf %35, %34 : vector<8x132xf32>
    %cst_13 = arith.constant 5.000000e-01 : f32
    %37 = vector.broadcast %cst_13 : f32 to vector<8x132xf32>
    %38 = arith.mulf %37, %28 : vector<8x132xf32>
    %39 = arith.addf %36, %38 : vector<8x132xf32>
    %c2_i32 = arith.constant 2 : i32
    %c3_i32_14 = arith.constant 3 : i32
    %40 = arith.subi %c3_i32_14, %c2_i32 : i32
    %41 = arith.index_cast %40 : i32 to index
    %c0_15 = arith.constant 0 : index
    %c0_16 = arith.constant 0 : index
    %c0_17 = arith.constant 0 : index
    %42 = vector.load %arg1[%41, %c0_15, %c0_16, %c0_17] : memref<4x1x132x132xbf16, #tpu.memory_space<vmem>>, vector<1x1x132x132xbf16>
    %43 = vector.shape_cast %42 : vector<1x1x132x132xbf16> to vector<132x132xbf16>
    %44 = arith.truncf %39 : vector<8x132xf32> to vector<8x132xbf16>
    %cst_18 = arith.constant dense<0.000000e+00> : vector<8x132xf32>
    %45 = tpu.matmul %44, %43, %cst_18 {dimension_numbers = #tpu.dot_dimension_numbers<[1], [0], [0], [1], [0, 0, 1, 1], [], []>} : vector<8x132xbf16>, vector<132x132xbf16>, vector<8x132xf32> -> vector<8x132xf32>
    %cst_19 = arith.constant 5.000000e-01 : f32
    %46 = vector.broadcast %cst_19 : f32 to vector<8x132xf32>
    %47 = arith.mulf %46, %45 : vector<8x132xf32>
    %cst_20 = arith.constant 5.000000e-01 : f32
    %48 = vector.broadcast %cst_20 : f32 to vector<8x132xf32>
    %49 = arith.mulf %48, %39 : vector<8x132xf32>
    %50 = arith.addf %47, %49 : vector<8x132xf32>
    %c3_i32_21 = arith.constant 3 : i32
    %c3_i32_22 = arith.constant 3 : i32
    %51 = arith.subi %c3_i32_22, %c3_i32_21 : i32
    %52 = arith.index_cast %51 : i32 to index
    %c0_23 = arith.constant 0 : index
    %c0_24 = arith.constant 0 : index
    %c0_25 = arith.constant 0 : index
    %53 = vector.load %arg1[%52, %c0_23, %c0_24, %c0_25] : memref<4x1x132x132xbf16, #tpu.memory_space<vmem>>, vector<1x1x132x132xbf16>
    %54 = vector.shape_cast %53 : vector<1x1x132x132xbf16> to vector<132x132xbf16>
    %55 = arith.truncf %50 : vector<8x132xf32> to vector<8x132xbf16>
    %cst_26 = arith.constant dense<0.000000e+00> : vector<8x132xf32>
    %56 = tpu.matmul %55, %54, %cst_26 {dimension_numbers = #tpu.dot_dimension_numbers<[1], [0], [0], [1], [0, 0, 1, 1], [], []>} : vector<8x132xbf16>, vector<132x132xbf16>, vector<8x132xf32> -> vector<8x132xf32>
    %cst_27 = arith.constant 5.000000e-01 : f32
    %57 = vector.broadcast %cst_27 : f32 to vector<8x132xf32>
    %58 = arith.mulf %57, %56 : vector<8x132xf32>
    %cst_28 = arith.constant 5.000000e-01 : f32
    %59 = vector.broadcast %cst_28 : f32 to vector<8x132xf32>
    %60 = arith.mulf %59, %50 : vector<8x132xf32>
    %61 = arith.addf %58, %60 : vector<8x132xf32>
    %c4_i32 = arith.constant 4 : i32
    %c0_29 = arith.constant 0 : index
    %c0_30 = arith.constant 0 : index
    %c0_31 = arith.constant 0 : index
    %62 = vector.load %arg2[%c0_29, %c0_30, %c0_31] : memref<1x8x132xf32, #tpu.memory_space<vmem>>, vector<1x8x132xf32>
    %63 = vector.shape_cast %62 : vector<1x8x132xf32> to vector<8x132xf32>
    %64 = vector.shape_cast %61 : vector<8x132xf32> to vector<1x8x132xf32>
    tpu.vector_store %arg2[%c0_29, %c0_30, %c0_31], %64 {strides = array<i32>} : memref<1x8x132xf32, #tpu.memory_space<vmem>>, vector<1x8x132xf32>,
    return
  }
  func.func @transform_0(%arg0: i32) -> (i32, i32, i32, i32) {
    %c0_i32 = arith.constant 0 : i32
    %c0_i32_0 = arith.constant 0 : i32
    %c0_i32_1 = arith.constant 0 : i32
    %c0_i32_2 = arith.constant 0 : i32
    return %c0_i32, %arg0, %c0_i32_0, %c0_i32_1 : i32, i32, i32, i32
  }
  func.func @transform_1(%arg0: i32) -> (i32, i32, i32) {
    %c0_i32 = arith.constant 0 : i32
    %c0_i32_0 = arith.constant 0 : i32
    %c0_i32_1 = arith.constant 0 : i32
    return %arg0, %c0_i32, %c0_i32_0 : i32, i32, i32
  }
}

</mosaic_0001>

<bundles_post_ra>
// kernel: tpu_custom_call.1
= control target key start
LH: loop header
LB: loop body
LE: loop exit
PB: predicated region body
PF: predicated region fallthrough
CT: control target
= control target key end

     0   :  { %6 = vsyncpa [#allocation4], 0  ;;  %s2159_s0 = inlined_call_operand.vmem [shape: bf16[4,2,132,132], index: 0, kind: input, shape index: {}]   ;;  %s2160_s1 = inlined_call_operand.hbm [shape: f32[2,8,132], index: 1, kind: output, shape index: {}]  }
   0x1   :  { %8 = vsyncpa [#allocation4 + $0x1], 0  ;;  %s1735_s6 = smov 0   ;;  %s1737_s7 = smov 0  }
   0x2   :  { %s1739_s8 = smov 0   ;;  %s1741_s9 = smov 0  }
   0x3 LB: > { %s1217_s10 = sadd.s32 4294967295, %s1721_s9   ;;  %s1218_s11 = sadd.s32 4294967294, %s1721_s9   ;;  %s1721_s9 = sphi %s1741_s9, %s2168_s9   ;;  %s1717_s8 = sphi %s1739_s8, %s2167_s8   ;;  %s1713_s7 = sphi %s1737_s7, %s2166_s7   ;;  %s1709_s6 = sphi %s1735_s6, %s2165_s6  }
   0x4   : > { %s1758_s12 = sadd.s32 1, %s1721_s9   ;;  %s21_s13 = sadd.s32 1, %s1717_s8 }
   0x5   : > { %s18_s14 = ssub.s32 %s1721_s9, %s1758_s12  ;;  %p28_p0 = scmp.ne.s32.totalorder %s1717_s8, %s1713_s7 }
   0x6   : > { %p19_p1 = scmp.eq.s32.totalorder %s18_s14, 0  ;;  %p29_p2 = scmp.eq.s32.totalorder %s1721_s9, 0 }
   0x7   : > { %p58_p3 = scmp.eq.s32.totalorder %s1217_s10, 1  ;;  %p63_p4 = scmp.ne.s32.totalorder %s1713_s7, %s1709_s6 }
   0x8   : > { %s1771_s15 = scalar_select %p19_p1, %s1717_s8, %s21_s13  }
   0x9   : > { %p30_p5 = por %p29_p2, %p28_p0  ;;  %p1773_p6 = por %p58_p3, %p28_p0 }
   0xa   : > { %p64_p7 = scmp.eq.s32.totalorder %s1218_s11, 1  ;;  %p1220_p9 = scmp.ge.s32.totalorder %s1721_s9, 2 }
   0xc   : > { %p1777_p8 = por %p64_p7, %p63_p4  ;;  %80 = sbr.rel (%p1220_p9) target bundleno = 90 (0x5a), region = 16 }
  0x11   : > { %83 = sbr.rel (!%p30_p5) target bundleno = 90 (0x5a), region = 20  ;;  %s85_s18 = sand.u32 (%p30_p5), 1, %s1717_s8  }
  0x12   : > { %s1616_s19 = smul.u32 (%p30_p5), 136, %s1721_s9 }
  0x13   : > { %s1615_s20 = smul.u32 (%p30_p5), 544, %s85_s18 }
  0x14   : > { %s1789_s23 = scalar_lea.vmem (%p30_p5), %s2159_s0, %s1616_s19 }
  0x15   : > { %v253_v0 = vld [vmem:[%s1789_s23] sm:$0xff] (%p30_p5)  ;;  %v255_v1 = vld [vmem:[%s1789_s23 + $0x8] sm:$0xff] (%p30_p5)  ;;  %v257_v2 = vld [vmem:[%s1789_s23 + $0x10] sm:$0xff] (%p30_p5)  ;;  %s1794_s24 = scalar_lea.vmem (%p30_p5), [#allocation2], %s1615_s20 }
  0x16   : > { %254 = vst [vmem:[%s1794_s24] sm:$0xff] %v253_v0  ;;  %v259_v3 = vld [vmem:[%s1789_s23 + $0x18] sm:$0xff]  ;;  %v261_v4 = vld [vmem:[%s1789_s23 + $0x20] sm:$0xff]  ;;  %v263_v5 = vld [vmem:[%s1789_s23 + $0x28] sm:$0xff] }
  0x17   : > { %256 = vst [vmem:[%s1794_s24 + $0x8] sm:$0xff] %v255_v1  ;;  %v265_v6 = vld [vmem:[%s1789_s23 + $0x30] sm:$0xff]  ;;  %v267_v7 = vld [vmem:[%s1789_s23 + $0x38] sm:$0xff]  ;;  %v269_v8 = vld [vmem:[%s1789_s23 + $0x40] sm:$0xff] }
  0x18   : > { %258 = vst [vmem:[%s1794_s24 + $0x10] sm:$0xff] %v257_v2  ;;  %v271_v9 = vld [vmem:[%s1789_s23 + $0x48] sm:$0xff]  ;;  %v273_v10 = vld [vmem:[%s1789_s23 + $0x50] sm:$0xff]  ;;  %v275_v11 = vld [vmem:[%s1789_s23 + $0x58] sm:$0xff] }
  0x19   : > { %260 = vst [vmem:[%s1794_s24 + $0x18] sm:$0xff] %v259_v3  ;;  %v277_v12 = vld [vmem:[%s1789_s23 + $0x60] sm:$0xff]  ;;  %v279_v13 = vld [vmem:[%s1789_s23 + $0x68] sm:$0xff]  ;;  %v281_v14 = vld [vmem:[%s1789_s23 + $0x70] sm:$0xff] }
  0x1a   : > { %262 = vst [vmem:[%s1794_s24 + $0x20] sm:$0xff] %v261_v4  ;;  %v283_v15 = vld [vmem:[%s1789_s23 + $0x78] sm:$0xff]  ;;  %v285_v16 = vld [vmem:[%s1789_s23 + $0x80] sm:$0xff]  ;;  %v287_v17 = vld [vmem:[%s1789_s23 + $0x110] sm:$0xff] }
  0x1b   : > { %264 = vst [vmem:[%s1794_s24 + $0x28] sm:$0xff] %v263_v5  ;;  %v289_v18 = vld [vmem:[%s1789_s23 + $0x118] sm:$0xff]  ;;  %v291_v19 = vld [vmem:[%s1789_s23 + $0x120] sm:$0xff]  ;;  %v293_v20 = vld [vmem:[%s1789_s23 + $0x128] sm:$0xff] }
  0x1c   : > { %266 = vst [vmem:[%s1794_s24 + $0x30] sm:$0xff] %v265_v6  ;;  %v295_v21 = vld [vmem:[%s1789_s23 + $0x130] sm:$0xff]  ;;  %v297_v22 = vld [vmem:[%s1789_s23 + $0x138] sm:$0xff]  ;;  %v299_v23 = vld [vmem:[%s1789_s23 + $0x140] sm:$0xff] }
  0x1d   : > { %268 = vst [vmem:[%s1794_s24 + $0x38] sm:$0xff] %v267_v7  ;;  %v301_v24 = vld [vmem:[%s1789_s23 + $0x148] sm:$0xff]  ;;  %v303_v25 = vld [vmem:[%s1789_s23 + $0x150] sm:$0xff]  ;;  %v305_v26 = vld [vmem:[%s1789_s23 + $0x158] sm:$0xff] }
  0x1e   : > { %270 = vst [vmem:[%s1794_s24 + $0x40] sm:$0xff] %v269_v8  ;;  %v307_v27 = vld [vmem:[%s1789_s23 + $0x160] sm:$0xff]  ;;  %v309_v28 = vld [vmem:[%s1789_s23 + $0x168] sm:$0xff]  ;;  %v311_v29 = vld [vmem:[%s1789_s23 + $0x170] sm:$0xff] }
  0x1f   : > { %272 = vst [vmem:[%s1794_s24 + $0x48] sm:$0xff] %v271_v9  ;;  %v313_v30 = vld [vmem:[%s1789_s23 + $0x178] sm:$0xff]  ;;  %v315_v31 = vld [vmem:[%s1789_s23 + $0x180] sm:$0xff]  ;;  %v317_v32 = vld [vmem:[%s1789_s23 + $0x188] sm:$0xff] }
  0x20   : > { %274 = vst [vmem:[%s1794_s24 + $0x50] sm:$0xff] %v273_v10  ;;  %v319_v33 = vld [vmem:[%s1789_s23 + $0x190] sm:$0xff]  ;;  %v321_v34 = vld [vmem:[%s1789_s23 + $0x220] sm:$0xff]  ;;  %v323_v35 = vld [vmem:[%s1789_s23 + $0x228] sm:$0xff] }
  0x21   : > { %276 = vst [vmem:[%s1794_s24 + $0x58] sm:$0xff] %v275_v11  ;;  %v325_v36 = vld [vmem:[%s1789_s23 + $0x230] sm:$0xff]  ;;  %v327_v37 = vld [vmem:[%s1789_s23 + $0x238] sm:$0xff]  ;;  %v329_v38 = vld [vmem:[%s1789_s23 + $0x240] sm:$0xff] }
  0x22   : > { %278 = vst [vmem:[%s1794_s24 + $0x60] sm:$0xff] %v277_v12  ;;  %v331_v39 = vld [vmem:[%s1789_s23 + $0x248] sm:$0xff]  ;;  %v333_v40 = vld [vmem:[%s1789_s23 + $0x250] sm:$0xff]  ;;  %v335_v41 = vld [vmem:[%s1789_s23 + $0x258] sm:$0xff] }
  0x23   : > { %280 = vst [vmem:[%s1794_s24 + $0x68] sm:$0xff] %v279_v13  ;;  %v337_v42 = vld [vmem:[%s1789_s23 + $0x260] sm:$0xff]  ;;  %v339_v43 = vld [vmem:[%s1789_s23 + $0x268] sm:$0xff]  ;;  %v341_v44 = vld [vmem:[%s1789_s23 + $0x270] sm:$0xff] }
  0x24   : > { %282 = vst [vmem:[%s1794_s24 + $0x70] sm:$0xff] %v281_v14  ;;  %v343_v45 = vld [vmem:[%s1789_s23 + $0x278] sm:$0xff]  ;;  %v345_v46 = vld [vmem:[%s1789_s23 + $0x280] sm:$0xff]  ;;  %v347_v47 = vld [vmem:[%s1789_s23 + $0x288] sm:$0xff] }
  0x25   : > { %284 = vst [vmem:[%s1794_s24 + $0x78] sm:$0xff] %v283_v15  ;;  %v349_v48 = vld [vmem:[%s1789_s23 + $0x290] sm:$0xff]  ;;  %v351_v49 = vld [vmem:[%s1789_s23 + $0x298] sm:$0xff]  ;;  %v353_v50 = vld [vmem:[%s1789_s23 + $0x2a0] sm:$0xff] }
  0x26   : > { %286 = vst [vmem:[%s1794_s24 + $0x80] sm:$0xff] %v285_v16  ;;  %v355_v51 = vld [vmem:[%s1789_s23 + $0x330] sm:$0xff]  ;;  %v357_v52 = vld [vmem:[%s1789_s23 + $0x338] sm:$0xff]  ;;  %v359_v53 = vld [vmem:[%s1789_s23 + $0x340] sm:$0xff] }
  0x27   : > { %288 = vst [vmem:[%s1794_s24 + $0x88] sm:$0xff] %v287_v17  ;;  %v361_v54 = vld [vmem:[%s1789_s23 + $0x348] sm:$0xff]  ;;  %v363_v55 = vld [vmem:[%s1789_s23 + $0x350] sm:$0xff]  ;;  %v365_v56 = vld [vmem:[%s1789_s23 + $0x358] sm:$0xff] }
  0x28   : > { %290 = vst [vmem:[%s1794_s24 + $0x90] sm:$0xff] %v289_v18  ;;  %v367_v57 = vld [vmem:[%s1789_s23 + $0x360] sm:$0xff]  ;;  %v369_v58 = vld [vmem:[%s1789_s23 + $0x368] sm:$0xff]  ;;  %v371_v59 = vld [vmem:[%s1789_s23 + $0x370] sm:$0xff] }
  0x29   : > { %292 = vst [vmem:[%s1794_s24 + $0x98] sm:$0xff] %v291_v19  ;;  %v373_v60 = vld [vmem:[%s1789_s23 + $0x378] sm:$0xff]  ;;  %v375_v61 = vld [vmem:[%s1789_s23 + $0x380] sm:$0xff]  ;;  %v377_v62 = vld [vmem:[%s1789_s23 + $0x388] sm:$0xff] }
  0x2a   : > { %294 = vst [vmem:[%s1794_s24 + $0xa0] sm:$0xff] %v293_v20  ;;  %v379_v63 = vld [vmem:[%s1789_s23 + $0x390] sm:$0xff]  ;;  %v381_v0 = vld [vmem:[%s1789_s23 + $0x398] sm:$0xff]  ;;  %v383_v1 = vld [vmem:[%s1789_s23 + $0x3a0] sm:$0xff] }
  0x2b   : > { %296 = vst [vmem:[%s1794_s24 + $0xa8] sm:$0xff] %v295_v21  ;;  %v385_v2 = vld [vmem:[%s1789_s23 + $0x3a8] sm:$0xff]  ;;  %v387_v3 = vld [vmem:[%s1789_s23 + $0x3b0] sm:$0xff] }
  0x2c   : > { %298 = vst [vmem:[%s1794_s24 + $0xb0] sm:$0xff] %v297_v22 }
  0x2d   : > { %300 = vst [vmem:[%s1794_s24 + $0xb8] sm:$0xff] %v299_v23 }
  0x2e   : > { %302 = vst [vmem:[%s1794_s24 + $0xc0] sm:$0xff] %v301_v24 }
  0x2f   : > { %304 = vst [vmem:[%s1794_s24 + $0xc8] sm:$0xff] %v303_v25 }
  0x30   : > { %306 = vst [vmem:[%s1794_s24 + $0xd0] sm:$0xff] %v305_v26 }
  0x31   : > { %308 = vst [vmem:[%s1794_s24 + $0xd8] sm:$0xff] %v307_v27 }
  0x32   : > { %310 = vst [vmem:[%s1794_s24 + $0xe0] sm:$0xff] %v309_v28 }
  0x33   : > { %312 = vst [vmem:[%s1794_s24 + $0xe8] sm:$0xff] %v311_v29 }
  0x34   : > { %314 = vst [vmem:[%s1794_s24 + $0xf0] sm:$0xff] %v313_v30 }
  0x35   : > { %316 = vst [vmem:[%s1794_s24 + $0xf8] sm:$0xff] %v315_v31 }
  0x36   : > { %318 = vst [vmem:[%s1794_s24 + $0x100] sm:$0xff] %v317_v32 }
  0x37   : > { %320 = vst [vmem:[%s1794_s24 + $0x108] sm:$0xff] %v319_v33 }
  0x38   : > { %322 = vst [vmem:[%s1794_s24 + $0x110] sm:$0xff] %v321_v34 }
  0x39   : > { %324 = vst [vmem:[%s1794_s24 + $0x118] sm:$0xff] %v323_v35 }
  0x3a   : > { %326 = vst [vmem:[%s1794_s24 + $0x120] sm:$0xff] %v325_v36 }
  0x3b   : > { %328 = vst [vmem:[%s1794_s24 + $0x128] sm:$0xff] %v327_v37 }
  0x3c   : > { %330 = vst [vmem:[%s1794_s24 + $0x130] sm:$0xff] %v329_v38 }
  0x3d   : > { %332 = vst [vmem:[%s1794_s24 + $0x138] sm:$0xff] %v331_v39 }
  0x3e   : > { %334 = vst [vmem:[%s1794_s24 + $0x140] sm:$0xff] %v333_v40 }
  0x3f   : > { %336 = vst [vmem:[%s1794_s24 + $0x148] sm:$0xff] %v335_v41 }
  0x40   : > { %338 = vst [vmem:[%s1794_s24 + $0x150] sm:$0xff] %v337_v42 }
  0x41   : > { %340 = vst [vmem:[%s1794_s24 + $0x158] sm:$0xff] %v339_v43 }
  0x42   : > { %342 = vst [vmem:[%s1794_s24 + $0x160] sm:$0xff] %v341_v44 }
  0x43   : > { %344 = vst [vmem:[%s1794_s24 + $0x168] sm:$0xff] %v343_v45 }
  0x44   : > { %346 = vst [vmem:[%s1794_s24 + $0x170] sm:$0xff] %v345_v46 }
  0x45   : > { %348 = vst [vmem:[%s1794_s24 + $0x178] sm:$0xff] %v347_v47 }
  0x46   : > { %350 = vst [vmem:[%s1794_s24 + $0x180] sm:$0xff] %v349_v48 }
  0x47   : > { %352 = vst [vmem:[%s1794_s24 + $0x188] sm:$0xff] %v351_v49 }
  0x48   : > { %354 = vst [vmem:[%s1794_s24 + $0x190] sm:$0xff] %v353_v50 }
  0x49   : > { %356 = vst [vmem:[%s1794_s24 + $0x198] sm:$0xff] %v355_v51 }
  0x4a   : > { %358 = vst [vmem:[%s1794_s24 + $0x1a0] sm:$0xff] %v357_v52 }
  0x4b   : > { %360 = vst [vmem:[%s1794_s24 + $0x1a8] sm:$0xff] %v359_v53 }
  0x4c   : > { %362 = vst [vmem:[%s1794_s24 + $0x1b0] sm:$0xff] %v361_v54 }
  0x4d   : > { %364 = vst [vmem:[%s1794_s24 + $0x1b8] sm:$0xff] %v363_v55 }
  0x4e   : > { %366 = vst [vmem:[%s1794_s24 + $0x1c0] sm:$0xff] %v365_v56 }
  0x4f   : > { %368 = vst [vmem:[%s1794_s24 + $0x1c8] sm:$0xff] %v367_v57 }
  0x50   : > { %370 = vst [vmem:[%s1794_s24 + $0x1d0] sm:$0xff] %v369_v58 }
  0x51   : > { %372 = vst [vmem:[%s1794_s24 + $0x1d8] sm:$0xff] %v371_v59 }
  0x52   : > { %374 = vst [vmem:[%s1794_s24 + $0x1e0] sm:$0xff] %v373_v60 }
  0x53   : > { %376 = vst [vmem:[%s1794_s24 + $0x1e8] sm:$0xff] %v375_v61 }
  0x54   : > { %378 = vst [vmem:[%s1794_s24 + $0x1f0] sm:$0xff] %v377_v62 }
  0x55   : > { %380 = vst [vmem:[%s1794_s24 + $0x1f8] sm:$0xff] %v379_v63 }
  0x56   : > { %382 = vst [vmem:[%s1794_s24 + $0x200] sm:$0xff] %v381_v0 }
  0x57   : > { %384 = vst [vmem:[%s1794_s24 + $0x208] sm:$0xff] %v383_v1 }
  0x58   : > { %386 = vst [vmem:[%s1794_s24 + $0x210] sm:$0xff] %v385_v2 }
  0x59   : > { %388 = vst [vmem:[%s1794_s24 + $0x218] sm:$0xff] %v387_v3 }
  0x5a PF: > { %p1222_p10 = scmp.ge.s32.totalorder %s1721_s9, 1  ;;  %p393_p11 = scmp.lt.s32.totalorder %s1721_s9, 3 }
  0x5c   : > { %p394_p12 = pnand %p1222_p10, %p393_p11 }
  0x5d   : > { %s1932_s25 = sand.u32 (!%p394_p12), 1, %s1713_s7   ;;  %s1614_s29 = sshll.u32 (!%p394_p12), %s1217_s10, 4 }
  0x5e   : > { %397 = sbr.rel (%p394_p12) target bundleno = 728 (0x2d8), region = 58  ;;  %s1223_s28 = sshll.u32 (!%p394_p12), %s1932_s25, 4 }
  0x5f   : > { %s1617_s26 = smul.u32 (!%p394_p12), 544, %s1932_s25  ;;  %s1148_s3 = scalar_lea.hbm (!%p394_p12), %s2160_s1, %s1614_s29 }
  0x60   : > { %s418_s4 = scalar_lea.vmem (!%p394_p12), [#allocation3], %s1223_s28  ;;  %s1152_s11 = sshll.u32 (!%p394_p12), %s1148_s3, 4  ;;  %s1153_s11 = int_to_ptr.hbm [resolvable:$true] %s1152_s11 }
  0x61   : > { %s1935_s27 = scalar_lea.vmem (!%p394_p12), [#allocation2], %s1617_s26  ;;  %s1150_s5 = sshll.u32 (!%p394_p12), %s418_s4, 4  ;;  %s1151_s5 = int_to_ptr.vmem [resolvable:$true] %s1150_s5 }
  0x62   : > { %s1137_s10 = scalar_lea.sflag (!%p394_p12), [#allocation4], %s1932_s25  ;;  %s1673_s13 = sshra.s32 (!%p394_p12), %s1153_s11, 4  ;;  %s1674_s13 = int_to_ptr.hbm [resolvable:$true] %s1673_s13 }
  0x63   : > { %v420_v4 = vlaneseq  ;;  %v1301_v7 = vld [vmem:[%s1935_s27 + $0x208] sm:$0xf]  ;;  %v1565_v8 = vld [vmem:[%s1935_s27 + $0x20c] sm:$0xf0]  ;;  %v1242_v9 = vld [vmem:[%s1935_s27 + $0x218] sm:$0x33]  ;;  %p1680_p2 = scmp.lt.s32.totalorder %s1674_s13, %s2160_s1 }
  0x64   : > { %v1302_v10 = vor.u32 %v1565_v8, %v1301_v7  ;;  %v514_v11 = vunpack.c.l.b16 %v1242_v9  ;;  %v1293_v12 = vld [vmem:[%s1935_s27 + $0x1f8] sm:$0xf]  ;;  %v1563_v13 = vld [vmem:[%s1935_s27 + $0x1fc] sm:$0xf0]  ;;  %v1564_v14 = vld [vmem:[%s1935_s27 + $0x20c] sm:$0xf]  ;;  %v515_v15 = vunpack.c.h.b16 %v1242_v9 }
  0x65   : > { %v421_v5 = vshrl.u32 %v420_v4, 7  ;;  %v423_v6 = vand.u32 127, %v420_v4  ;;  %vm554_vm0 = vcmask 1041408   ;;  %v1303_v16 = vld [vmem:[%s1935_s27 + $0x210] sm:$0xf0]  ;;  %v1294_v18 = vor.u32 %v1563_v13, %v1293_v12  ;;  %s1675_s14 = scalar_lea.hbm %s1674_s13, 16 }
  0x66   : > { %561 = vmatpush.bf16.msra.mxu0 %v1302_v10  ;;  %v532_v17 = vpack.c.b16 %v514_v11, %v514_v11  ;;  %v1306_v19 = vor.u32 %v1564_v14, %v1303_v16  ;;  %v1285_v20 = vld [vmem:[%s1935_s27 + $0x1e8] sm:$0xf]  ;;  %v1561_v21 = vld [vmem:[%s1935_s27 + $0x1ec] sm:$0xf0]  ;;  %v1562_v23 = vld [vmem:[%s1935_s27 + $0x1fc] sm:$0xf]  ;;  %v533_v25 = vpack.c.b16 %v515_v15, %v515_v15  ;;  %p1676_p13 = scmp.ne.s32.totalorder %s1674_s13, %s1675_s14 }
  0x67   : > { %v424_v22 = vadd.s32 128, %v423_v6  ;;  %v1295_v24 = vld [vmem:[%s1935_s27 + $0x200] sm:$0xf0]  ;;  %vm430_vm1 = vcmp.eq.s32.totalorder %v421_v5, 1  ;;  %v1286_v28 = vor.u32 %v1561_v21, %v1285_v20  ;;  %v1277_v30 = vld [vmem:[%s1935_s27 + $0x1d8] sm:$0xf] }
  0x68   : > { %v556_v26 = vsel %vm554_vm0, %v532_v17, 0  ;;  %v559_v27 = vsel %vm554_vm0, %v533_v25, 0  ;;  %v1298_v29 = vor.u32 %v1562_v23, %v1295_v24  ;;  %v1559_v31 = vld [vmem:[%s1935_s27 + $0x1dc] sm:$0xf0]  ;;  %vm425_vm6 = vcmp.eq.s32.totalorder %v421_v5, 0  ;;  %p1677_p0 = pnand %p1676_p13, %p1773_p6  ;;  %s1679_s20 = scalar_lea.hbm %s2160_s1, 32 }
  0x69   : > { %vm432_vm2 = vcmp.eq.s32.totalorder %v424_v22, 131  ;;  %vm434_vm3 = vcmp.eq.s32.totalorder %v424_v22, 130  ;;  %581 = vmatpush.bf16.msra.mxu2 %v556_v26  ;;  %v1723_v32 = vmov 0.0   ;;  %v1560_v34 = vld [vmem:[%s1935_s27 + $0x1ec] sm:$0xf]  ;;  %607 = vmatpush.bf16.msra.mxu3 %v559_v27  ;;  %vm426_vm7 = vcmp.eq.s32.totalorder %v423_v6, 0  ;;  %p1681_p3 = scmp.lt.s32.totalorder %s1679_s20, %s1675_s14 }
  0x6a   : > { %vm436_vm4 = vmor %vm432_vm2, %vm434_vm3  ;;  %562 = vmatpush.bf16.msra.mxu0 %v1294_v18  ;;  %v1287_v35 = vld [vmem:[%s1935_s27 + $0x1f0] sm:$0xf0]  ;;  %vm550_vm8 = vcmask 31744   ;;  %v1278_v37 = vor.u32 %v1559_v31, %v1277_v30  ;;  %v1269_v39 = vld [vmem:[%s1935_s27 + $0x1c8] sm:$0xf]  ;;  %p1678_p1 = pneg %p1677_p0 }
  0x6b   : > { %vm438_vm5 = vmand %vm430_vm1, %vm436_vm4  ;;  %v1290_v38 = vor.u32 %v1560_v34, %v1287_v35  ;;  %v1557_v40 = vld [vmem:[%s1935_s27 + $0x1cc] sm:$0xf0]  ;;  %v1558_v42 = vld [vmem:[%s1935_s27 + $0x1dc] sm:$0xf]  ;;  %v1724_v10 = vmov 1.0|1.0   ;;  %p1682_p4 = por %p1681_p3, %p1680_p2 }
  0x6c   : > { %v1952_v33 = vsel %vm438_vm5, 1.0, %v1723_v32  ;;  %vm1961_vm9 = vmand %vm425_vm6, %vm426_vm7  ;;  %v1279_v43 = vld [vmem:[%s1935_s27 + $0x1e0] sm:$0xf0]  ;;  %v1388_v45 = vld [vmem:[%s1935_s27 + $0x180] sm:$0xf]  ;;  %v1270_v48 = vor.u32 %v1557_v40, %v1269_v39 }
  0x6d   : > { %587 = vmatpush.bf16.msrb.mxu2 %v1306_v19  ;;  %v464_v36 = vpack.c.bf16 %v1952_v33, %v1952_v33  ;;  %v1971_v44 = vsel %vm1961_vm9, 1.0, %v1723_v32  ;;  %v1581_v46 = vld [vmem:[%s1935_s27 + $0x184] sm:$0xf0]  ;;  %v1380_v47 = vld [vmem:[%s1935_s27 + $0x170] sm:$0xf]  ;;  %v1282_v49 = vor.u32 %v1558_v42, %v1279_v43  ;;  %vm1307_vm10 = vmpackc.low %vm1961_vm9, %vm1961_vm9  ;;  %p1683_p5 = pnand %p1682_p4, %p1678_p1 }
  0x6e   : > { %563 = vmatpush.bf16.msra.mxu0 %v1286_v28  ;;  %v1261_v50 = vld [vmem:[%s1935_s27 + $0x1b8] sm:$0xf]  ;;  %v1389_v51 = vor.u32 %v1581_v46, %v1388_v45  ;;  %v1555_v53 = vld [vmem:[%s1935_s27 + $0x1bc] sm:$0xf0]  ;;  %v1556_v54 = vld [vmem:[%s1935_s27 + $0x1cc] sm:$0xf] }
  0x6f   : > { %1309 = vmatmul.msk.bf16.vlgmr.msra.gmra.mxu2 %vm550_vm8, %v464_v36  ;;  %1312 = vmatmul.msk.bf16.vlgmr.msra.gmra.mxu3 %vm550_vm8, %v464_v36  ;;  %v1579_v52 = vld [vmem:[%s1935_s27 + $0x174] sm:$0xf0]  ;;  %v1271_v55 = vld [vmem:[%s1935_s27 + $0x1d0] sm:$0xf0]  ;;  %v1262_v57 = vor.u32 %v1555_v53, %v1261_v50  ;;  %v1253_v59 = vld [vmem:[%s1935_s27 + $0x1a8] sm:$0xf] }
  0x70   : > { %733 = vmatpush.bf16.msra.mxu1 %v1389_v51  ;;  %v1381_v56 = vor.u32 %v1579_v52, %v1380_v47  ;;  %v1274_v58 = vor.u32 %v1556_v54, %v1271_v55  ;;  %v1553_v60 = vld [vmem:[%s1935_s27 + $0x1ac] sm:$0xf0]  ;;  %v1554_v61 = vld [vmem:[%s1935_s27 + $0x1bc] sm:$0xf]  ;;  %v1263_v62 = vld [vmem:[%s1935_s27 + $0x1c0] sm:$0xf0] }
  0x71   : > { %588 = vmatpush.bf16.msrb.mxu2 %v1298_v29  ;;  %v1254_v63 = vor.u32 %v1553_v60, %v1253_v59  ;;  %v1266_v0 = vor.u32 %v1554_v61, %v1263_v62  ;;  %v1245_v1 = vld [vmem:[%s1935_s27 + $0x198] sm:$0xf]  ;;  %v1551_v2 = vld [vmem:[%s1935_s27 + $0x19c] sm:$0xf0]  ;;  %v1552_v3 = vld [vmem:[%s1935_s27 + $0x1ac] sm:$0xf] }
  0x72   : > { %564 = vmatpush.bf16.msra.mxu0 %v1278_v37  ;;  %v1255_v4 = vld [vmem:[%s1935_s27 + $0x1b0] sm:$0xf0]  ;;  %v1246_v5 = vor.u32 %v1551_v2, %v1245_v1  ;;  %v1550_v7 = vld [vmem:[%s1935_s27 + $0x19c] sm:$0xf]  ;;  %v1247_v8 = vld [vmem:[%s1935_s27 + $0x1a0] sm:$0xf0] }
  0x73   : > { %v1258_v6 = vor.u32 %v1552_v3, %v1255_v4  ;;  %v1250_v9 = vor.u32 %v1550_v7, %v1247_v8  ;;  %v1372_v11 = vld [vmem:[%s1935_s27 + $0x160] sm:$0xf]  ;;  %v1577_v12 = vld [vmem:[%s1935_s27 + $0x164] sm:$0xf0]  ;;  %v1364_v14 = vld [vmem:[%s1935_s27 + $0x150] sm:$0xf] }
  0x74   : > { %734 = vmatpush.bf16.msra.mxu1 %v1381_v56  ;;  %v1373_v13 = vor.u32 %v1577_v12, %v1372_v11  ;;  %v1575_v15 = vld [vmem:[%s1935_s27 + $0x154] sm:$0xf0]  ;;  %v1356_v17 = vld [vmem:[%s1935_s27 + $0x140] sm:$0xf]  ;;  %v1573_v18 = vld [vmem:[%s1935_s27 + $0x144] sm:$0xf0] }
  0x75   : > { %589 = vmatpush.bf16.msrb.mxu2 %v1290_v38  ;;  %v1365_v16 = vor.u32 %v1575_v15, %v1364_v14  ;;  %v1357_v19 = vor.u32 %v1573_v18, %v1356_v17  ;;  %v1348_v20 = vld [vmem:[%s1935_s27 + $0x130] sm:$0xf]  ;;  %v1571_v21 = vld [vmem:[%s1935_s27 + $0x134] sm:$0xf0]  ;;  %v1340_v25 = vld [vmem:[%s1935_s27 + $0x120] sm:$0xf] }
  0x76   : > { %565 = vmatpush.bf16.msra.mxu0 %v1270_v48  ;;  %v1349_v22 = vor.u32 %v1571_v21, %v1348_v20  ;;  %v1329_v23 = vld [vmem:[%s1935_s27 + $0x190] sm:$0x33]  ;;  %v1569_v26 = vld [vmem:[%s1935_s27 + $0x124] sm:$0xf0]  ;;  %v1580_v29 = vld [vmem:[%s1935_s27 + $0x184] sm:$0xf] }
  0x77   : > { %v688_v24 = vunpack.c.l.b16 %v1329_v23  ;;  %v1341_v27 = vor.u32 %v1569_v26, %v1340_v25  ;;  %v1390_v30 = vld [vmem:[%s1935_s27 + $0x188] sm:$0xf0]  ;;  %v1332_v34 = vld [vmem:[%s1935_s27 + $0x110] sm:$0xf]  ;;  %v1567_v35 = vld [vmem:[%s1935_s27 + $0x114] sm:$0xf0]  ;;  %v689_v43 = vunpack.c.h.b16 %v1329_v23 }
  0x78   : > { %735 = vmatpush.bf16.msra.mxu1 %v1373_v13  ;;  %v1393_v32 = vor.u32 %v1580_v29, %v1390_v30  ;;  %v1333_v36 = vor.u32 %v1567_v35, %v1332_v34  ;;  %v1578_v37 = vld [vmem:[%s1935_s27 + $0x174] sm:$0xf]  ;;  %v1382_v38 = vld [vmem:[%s1935_s27 + $0x178] sm:$0xf0]  ;;  %v1576_v40 = vld [vmem:[%s1935_s27 + $0x164] sm:$0xf] }
  0x79   : > { %590 = vmatpush.bf16.msrb.mxu2 %v1282_v49  ;;  %v706_v28 = vpack.c.b16 %v688_v24, %v688_v24  ;;  %v1385_v39 = vor.u32 %v1578_v37, %v1382_v38  ;;  %v1374_v41 = vld [vmem:[%s1935_s27 + $0x168] sm:$0xf0]  ;;  %v1574_v45 = vld [vmem:[%s1935_s27 + $0x154] sm:$0xf]  ;;  %v1366_v46 = vld [vmem:[%s1935_s27 + $0x158] sm:$0xf0]  ;;  %v707_v47 = vpack.c.b16 %v689_v43, %v689_v43 }
  0x7a   : > { %566 = vmatpush.bf16.msra.mxu0 %v1262_v57  ;;  %v1377_v42 = vor.u32 %v1576_v40, %v1374_v41  ;;  %v1369_v48 = vor.u32 %v1574_v45, %v1366_v46  ;;  %v1572_v52 = vld [vmem:[%s1935_s27 + $0x144] sm:$0xf]  ;;  %v1358_v53 = vld [vmem:[%s1935_s27 + $0x148] sm:$0xf0]  ;;  %v1570_v55 = vld [vmem:[%s1935_s27 + $0x134] sm:$0xf] }
  0x7b   : > { %v728_v31 = vsel %vm554_vm0, %v706_v28, 0  ;;  %v731_v49 = vsel %vm554_vm0, %v707_v47, 0  ;;  %v1361_v54 = vor.u32 %v1572_v52, %v1358_v53  ;;  %v1350_v56 = vld [vmem:[%s1935_s27 + $0x138] sm:$0xf0]  ;;  %v1342_v59 = vld [vmem:[%s1935_s27 + $0x128] sm:$0xf0] }
  0x7c   : > { %736 = vmatpush.bf16.msra.mxu1 %v1365_v16  ;;  %753 = vmatpush.bf16.msrb.mxu3 %v728_v31  ;;  %v1353_v57 = vor.u32 %v1570_v55, %v1350_v56  ;;  %v615_v3 = vmul.f32 0.5, %v1971_v44  ;;  %v1597_v7 = vld [vmem:[%s1935_s27 + $0xfc] sm:$0xf0]  ;;  %v1463_v11 = vld [vmem:[%s1935_s27 + $0xe8] sm:$0xf] }
  0x7d   : > { %591 = vmatpush.bf16.msrb.mxu2 %v1274_v58  ;;  %v1568_v58 = vld [vmem:[%s1935_s27 + $0x124] sm:$0xf]  ;;  %v1595_v14 = vld [vmem:[%s1935_s27 + $0xec] sm:$0xf0]  ;;  %v1594_v15 = vld [vmem:[%s1935_s27 + $0xec] sm:$0xf] }
  0x7e   : > { %567 = vmatpush.bf16.msra.mxu0 %v1254_v63  ;;  %v1345_v62 = vor.u32 %v1568_v58, %v1342_v59  ;;  %v1566_v63 = vld [vmem:[%s1935_s27 + $0x114] sm:$0xf]  ;;  %v1464_v17 = vor.u32 %v1595_v14, %v1463_v11  ;;  %v1593_v28 = vld [vmem:[%s1935_s27 + $0xdc] sm:$0xf0]  ;;  %v1457_v30 = vld [vmem:[%s1935_s27 + $0xe0] sm:$0xf0] }
  0x7f   : > { %v1465_v16 = vld [vmem:[%s1935_s27 + $0xf0] sm:$0xf0]  ;;  %v1447_v31 = vld [vmem:[%s1935_s27 + $0xc8] sm:$0xf]  ;;  %v1590_v35 = vld [vmem:[%s1935_s27 + $0xcc] sm:$0xf] }
  0x80   : > { %737 = vmatpush.bf16.msra.mxu1 %v1357_v19  ;;  %759 = vmatpush.bf16.msra.mxu3 %v1393_v32  ;;  %v1468_v44 = vor.u32 %v1594_v15, %v1465_v16  ;;  %v1591_v32 = vld [vmem:[%s1935_s27 + $0xcc] sm:$0xf0]  ;;  %v1589_v40 = vld [vmem:[%s1935_s27 + $0xbc] sm:$0xf0]  ;;  %v1588_v41 = vld [vmem:[%s1935_s27 + $0xbc] sm:$0xf] }
  0x81   : > { %592 = vmatpush.bf16.msrb.mxu2 %v1266_v0  ;;  %v1334_v0 = vld [vmem:[%s1935_s27 + $0x118] sm:$0xf0]  ;;  %v1448_v37 = vor.u32 %v1591_v32, %v1447_v31  ;;  %v1441_v43 = vld [vmem:[%s1935_s27 + $0xc0] sm:$0xf0]  ;;  %v1431_v46 = vld [vmem:[%s1935_s27 + $0xa8] sm:$0xf] }
  0x82   : > { %568 = vmatpush.bf16.msra.mxu0 %v1246_v5  ;;  %v1337_v1 = vor.u32 %v1566_v63, %v1334_v0  ;;  %v1444_v45 = vor.u32 %v1588_v41, %v1441_v43  ;;  %v1587_v47 = vld [vmem:[%s1935_s27 + $0xac] sm:$0xf0]  ;;  %v1423_v52 = vld [vmem:[%s1935_s27 + $0x98] sm:$0xf]  ;;  %v1585_v53 = vld [vmem:[%s1935_s27 + $0x9c] sm:$0xf0] }
  0x83   : > { %v1424_v55 = vor.u32 %v1585_v53, %v1423_v52  ;;  %v1425_v56 = vld [vmem:[%s1935_s27 + $0xa0] sm:$0xf0]  ;;  %v1415_v58 = vld [vmem:[%s1935_s27 + $0x88] sm:$0xf]  ;;  %v1583_v59 = vld [vmem:[%s1935_s27 + $0x8c] sm:$0xf0] }
  0x84   : > { %738 = vmatpush.bf16.msra.mxu1 %v1349_v22  ;;  %760 = vmatpush.bf16.msra.mxu3 %v1385_v39  ;;  %v616_v22 = vmul.f32 0.5, %v1952_v33  ;;  %v1592_v33 = vld [vmem:[%s1935_s27 + $0xdc] sm:$0xf]  ;;  %v1439_v39 = vld [vmem:[%s1935_s27 + $0xb8] sm:$0xf] }
  0x85   : > { %593 = vmatpush.bf16.msrb.mxu2 %v1258_v6  ;;  %1308 = vmatmul.msk.bf16.vlgmr.msra.gmra.mxu0 %vm1307_vm10, %v1724_v10  ;;  %v1471_v6 = vld [vmem:[%s1935_s27 + $0xf8] sm:$0xf]  ;;  %v1460_v34 = vor.u32 %v1592_v33, %v1457_v30  ;;  %v1412_v0 = vld [vmem:[%s1935_s27 + $0x108] sm:$0x33]  ;;  %v1539_v33 = vld [vmem:[%s1935_s27 + $0x78] sm:$0xf0] }
  0x86   : > { %779 = vmatpush.bf16.msrb.mxu0 %v731_v49  ;;  %v1472_v8 = vor.u32 %v1597_v7, %v1471_v6  ;;  %v1432_v49 = vor.u32 %v1587_v47, %v1431_v46  ;;  %v1610_v32 = vld [vmem:[%s1935_s27 + $0x64] sm:$0xf]  ;;  %v1607_v43 = vld [vmem:[%s1935_s27 + $0x44] sm:$0xf0]  ;;  %v1515_v47 = vld [vmem:[%s1935_s27 + $0x48] sm:$0xf0] }
  0x87   : > { %v1507_v53 = vld [vmem:[%s1935_s27 + $0x38] sm:$0xf0] }
  0x88   : > { %739 = vmatpush.bf16.msra.mxu1 %v1341_v27  ;;  %761 = vmatpush.bf16.msra.mxu3 %v1377_v42  ;;  %v1455_v27 = vld [vmem:[%s1935_s27 + $0xd8] sm:$0xf]  ;;  %v1440_v42 = vor.u32 %v1589_v40, %v1439_v39  ;;  %v1523_v40 = vld [vmem:[%s1935_s27 + $0x58] sm:$0xf0] }
  0x89   : > { %594 = vmatpush.bf16.msrb.mxu2 %v1250_v9  ;;  %v1596_v9 = vld [vmem:[%s1935_s27 + $0xfc] sm:$0xf]  ;;  %v1456_v29 = vor.u32 %v1593_v28, %v1455_v27  ;;  %v1612_v28 = vld [vmem:[%s1935_s27 + $0x74] sm:$0xf] }
  0x8a   : > { %v1542_v30 = vor.u32 %v1612_v28, %v1539_v33 }
  0x8c   : > { %1311 = vmatmul.msk.bf16.vlgmr.msrb.gmra.mxu2 %vm1307_vm10, %v1724_v10  ;;  %740 = vmatpush.bf16.msra.mxu1 %v1333_v36  ;;  %v1473_v10 = vld [vmem:[%s1935_s27 + $0x100] sm:$0xf0]  ;;  %v1449_v36 = vld [vmem:[%s1935_s27 + $0xd0] sm:$0xf0] }
  0x8d   : > { %762 = vmatpush.bf16.msra.mxu3 %v1369_v48  ;;  %v1476_v13 = vor.u32 %v1596_v9, %v1473_v10  ;;  %905 = vmatpush.bf16.msra.mxu2 %v1472_v8  ;;  %v1452_v38 = vor.u32 %v1590_v35, %v1449_v36  ;;  %v1586_v48 = vld [vmem:[%s1935_s27 + $0xac] sm:$0xf]  ;;  %v1521_v36 = vld [vmem:[%s1935_s27 + $0x50] sm:$0xf] }
  0x8f   : > { %931 = vmatpush.bf16.msra.mxu0 %v1476_v13 }
  0x91   : > { %763 = vmatpush.bf16.msra.mxu3 %v1361_v54  ;;  %906 = vmatpush.bf16.msra.mxu2 %v1464_v17  ;;  %v1584_v54 = vld [vmem:[%s1935_s27 + $0x9c] sm:$0xf] }
  0x93   : > { %932 = vmatpush.bf16.msra.mxu0 %v1468_v44  ;;  %v1537_v44 = vld [vmem:[%s1935_s27 + $0x70] sm:$0xf] }
  0x95   : > { %764 = vmatpush.bf16.msra.mxu3 %v1353_v57  ;;  %907 = vmatpush.bf16.msra.mxu2 %v1456_v29  ;;  %v1428_v57 = vor.u32 %v1584_v54, %v1425_v56  ;;  %v1603_v56 = vld [vmem:[%s1935_s27 + $0x24] sm:$0xf0] }
  0x97   : > { %933 = vmatpush.bf16.msra.mxu0 %v1460_v34  ;;  %v1531_v34 = vld [vmem:[%s1935_s27 + $0x68] sm:$0xf0] }
  0x99   : > { %765 = vmatpush.bf16.msra.mxu3 %v1345_v62  ;;  %908 = vmatpush.bf16.msra.mxu2 %v1448_v37  ;;  %v1417_v62 = vld [vmem:[%s1935_s27 + $0x90] sm:$0xf0]  ;;  %v1609_v37 = vld [vmem:[%s1935_s27 + $0x54] sm:$0xf0] }
  0x9a   : > { %v1522_v39 = vor.u32 %v1609_v37, %v1521_v36 }
  0x9b   : > { %934 = vmatpush.bf16.msra.mxu0 %v1452_v38  ;;  %v1608_v38 = vld [vmem:[%s1935_s27 + $0x54] sm:$0xf] }
  0x9c   : > { %v1526_v41 = vor.u32 %v1608_v38, %v1523_v40 }
  0x9d   : > { %766 = vmatpush.bf16.msra.mxu3 %v1337_v1  ;;  %909 = vmatpush.bf16.msra.mxu2 %v1440_v42  ;;  %v860_v1 = vunpack.c.l.b16 %v1412_v0  ;;  %v1513_v42 = vld [vmem:[%s1935_s27 + $0x40] sm:$0xf] }
  0x9e   : > { %v1514_v46 = vor.u32 %v1607_v43, %v1513_v42 }
  0x9f   : > { %935 = vmatpush.bf16.msra.mxu0 %v1444_v45  ;;  %v1606_v45 = vld [vmem:[%s1935_s27 + $0x44] sm:$0xf] }
  0xa1   : > { %910 = vmatpush.bf16.msra.mxu2 %v1432_v49  ;;  %v1505_v49 = vld [vmem:[%s1935_s27 + $0x30] sm:$0xf] }
  0xa5   : > { %911 = vmatpush.bf16.msra.mxu2 %v1424_v55  ;;  %v1497_v55 = vld [vmem:[%s1935_s27 + $0x20] sm:$0xf] }
  0xf2   : > { %v583_v50 = vpop.f32.mrf.mxu2  ;;  %v609_v51 = vpop.f32.mrf.mxu3 }
  0xfa   : > { %v585_v60 = vpop.f32.mrf.mxu2  ;;  %v611_v61 = vpop.f32.mrf.mxu3 }
  0xfb   : > { %v1582_v60 = vld [vmem:[%s1935_s27 + $0x8c] sm:$0xf]  ;;  %v1416_v61 = vor.u32 %v1583_v59, %v1415_v58  ;;  %v1498_v58 = vor.u32 %v1603_v56, %v1497_v55 }
  0xfc   : > { %v1420_v63 = vor.u32 %v1582_v60, %v1417_v62  ;;  %v1499_v59 = vld [vmem:[%s1935_s27 + $0x28] sm:$0xf0]  ;;  %v1601_v62 = vld [vmem:[%s1935_s27 + $0x14] sm:$0xf0] }
  0xfd   : > { %912 = vmatpush.bf16.msra.mxu2 %v1416_v61  ;;  %v1489_v61 = vld [vmem:[%s1935_s27 + $0x10] sm:$0xf] }
 0x102   : > { %v570_v2 = vpop.f32.mrf.mxu0 }
 0x103   : > { %v584_v4 = vadd.f32 %v583_v50, %v570_v2  ;;  %v1433_v50 = vld [vmem:[%s1935_s27 + $0xb0] sm:$0xf0]  ;;  %v878_v2 = vpack.c.b16 %v860_v1, %v860_v1  ;;  %v1491_v1 = vld [vmem:[%s1935_s27 + $0x18] sm:$0xf0] }
 0x105   : > { %v613_v5 = vmul.f32 0.5, %v584_v4 }
 0x107   : > { %v2031_v12 = vadd.f32 %v615_v3, %v613_v5  ;;  %v900_v3 = vsel %vm554_vm0, %v878_v2, 0  ;;  %v861_v5 = vunpack.c.h.b16 %v1412_v0  ;;  %v1490_v0 = vor.u32 %v1601_v62, %v1489_v61 }
 0x108   : > { %925 = vmatpush.bf16.msrb.mxu1 %v900_v3  ;;  %v1481_v3 = vld [vmem:[%s1935_s27] sm:$0xf] }
 0x109   : > { %v637_v18 = vpack.c.bf16 %v2031_v12, %v2031_v12  ;;  %v879_v7 = vpack.c.b16 %v861_v5, %v861_v5  ;;  %v787_v15 = vmul.f32 0.5, %v2031_v12  ;;  %v1598_v5 = vld [vmem:[%s1935_s27 + $0x4] sm:$0xf] }
 0x10a   : > { %v572_v19 = vpop.f32.mrf.mxu0 }
 0x10b   : > { %741 = vmatmul.bf16.vlgmr.msra.gmra.mxu1 %v637_v18  ;;  %v903_v9 = vsel %vm554_vm0, %v879_v7, 0  ;;  %v1613_v19 = vld [vmem:[%s1935_s27 + $0x74] sm:$0xf0]  ;;  %v1483_v7 = vld [vmem:[%s1935_s27 + $0x8] sm:$0xf0] }
 0x10c   : > { %951 = vmatpush.bf16.msra.mxu1 %v903_v9  ;;  %v979_v9 = vld [vmem:[%s1935_s27 + $0x80] sm:$0x33] }
 0x10f   : > { %v596_v20 = vpop.f32.mrf.mxu2 }
 0x110   : > { %v610_v21 = vadd.f32 %v609_v51, %v596_v20  ;;  %v1436_v51 = vor.u32 %v1586_v48, %v1433_v50  ;;  %v1538_v20 = vor.u32 %v1613_v19, %v1537_v44  ;;  %v1518_v48 = vor.u32 %v1606_v45, %v1515_v47  ;;  %v1605_v50 = vld [vmem:[%s1935_s27 + $0x34] sm:$0xf0] }
 0x111   : > { %v1506_v52 = vor.u32 %v1605_v50, %v1505_v49 }
 0x112   : > { %v614_v23 = vmul.f32 0.5, %v610_v21  ;;  %936 = vmatpush.bf16.msra.mxu0 %v1436_v51  ;;  %v1529_v21 = vld [vmem:[%s1935_s27 + $0x60] sm:$0xf]  ;;  %v1604_v51 = vld [vmem:[%s1935_s27 + $0x34] sm:$0xf] }
 0x113   : > { %v1510_v54 = vor.u32 %v1604_v51, %v1507_v53 }
 0x114   : > { %v2039_v24 = vadd.f32 %v616_v22, %v614_v23  ;;  %v1611_v22 = vld [vmem:[%s1935_s27 + $0x64] sm:$0xf0] }
 0x115   : > { %v1530_v23 = vor.u32 %v1611_v22, %v1529_v21 }
 0x116   : > { %v638_v25 = vpack.c.bf16 %v2039_v24, %v2039_v24  ;;  %937 = vmatpush.bf16.msra.mxu0 %v1428_v57  ;;  %v788_v27 = vmul.f32 0.5, %v2039_v24  ;;  %v1534_v24 = vor.u32 %v1610_v32, %v1531_v34  ;;  %v1602_v57 = vld [vmem:[%s1935_s27 + $0x24] sm:$0xf] }
 0x117   : > { %v598_v26 = vpop.f32.mrf.mxu2  ;;  %v1502_v60 = vor.u32 %v1602_v57, %v1499_v59 }
 0x118   : > { %1394 = vmatmul.msk.bf16.vlgmr.msrb.gmra.mxu3 %vm550_vm8, %v638_v25  ;;  %1395 = vmatmul.msk.bf16.vlgmr.msrb.gmra.mxu0 %vm550_vm8, %v638_v25 }
 0x119   : > { %1076 = vmatpush.bf16.msrb.mxu3 %v1538_v20 }
 0x11a   : > { %938 = vmatpush.bf16.msra.mxu0 %v1420_v63  ;;  %v1600_v63 = vld [vmem:[%s1935_s27 + $0x14] sm:$0xf] }
 0x11b   : > { %v1494_v2 = vor.u32 %v1600_v63, %v1491_v1 }
 0x11d   : > { %1077 = vmatpush.bf16.msrb.mxu3 %v1530_v23 }
 0x121   : > { %1078 = vmatpush.bf16.msrb.mxu3 %v1522_v39 }
 0x125   : > { %1079 = vmatpush.bf16.msrb.mxu3 %v1514_v46 }
 0x128   : > { %767 = vmatmul.bf16.vlgmr.msra.gmra.mxu3 %v637_v18 }
 0x129   : > { %1080 = vmatpush.bf16.msrb.mxu3 %v1506_v52 }
 0x12d   : > { %1081 = vmatpush.bf16.msrb.mxu3 %v1498_v58 }
 0x131   : > { %1082 = vmatpush.bf16.msrb.mxu3 %v1490_v0 }
 0x188   : > { %v742_v4 = vpop.f32.mrf.mxu1 }
 0x190   : > { %v744_v6 = vpop.f32.mrf.mxu1 }
 0x195   : > { %v781_v8 = vpop.f32.mrf.mxu0 }
 0x19b   : > { %v755_v10 = vpop.f32.mrf.mxu3 }
 0x19c   : > { %v756_v11 = vadd.f32 %v755_v10, %v742_v4  ;;  %v1599_v4 = vld [vmem:[%s1935_s27 + $0x4] sm:$0xf0]  ;;  %v1031_v10 = vunpack.c.l.b16 %v979_v9 }
 0x19d   : > { %v783_v13 = vpop.f32.mrf.mxu0  ;;  %v1482_v6 = vor.u32 %v1599_v4, %v1481_v3 }
 0x19e   : > { %v785_v14 = vmul.f32 0.5, %v756_v11  ;;  %v1032_v11 = vunpack.c.h.b16 %v979_v9  ;;  %v1049_v13 = vpack.c.b16 %v1031_v10, %v1031_v10 }
 0x19f   : > { %1083 = vmatpush.bf16.msrb.mxu3 %v1482_v6 }
 0x1a0   : > { %v2073_v16 = vadd.f32 %v787_v15, %v785_v14  ;;  %v1050_v14 = vpack.c.b16 %v1032_v11, %v1032_v11  ;;  %v1071_v15 = vsel %vm554_vm0, %v1049_v13, 0 }
 0x1a1   : > { %1096 = vmatpush.bf16.msrb.mxu2 %v1071_v15 }
 0x1a2   : > { %v809_v17 = vpack.c.bf16 %v2073_v16, %v2073_v16 }
 0x1a3   : > { %v757_v18 = vpop.f32.mrf.mxu3 }
 0x1a4   : > { %913 = vmatmul.bf16.vlgmr.msra.gmra.mxu2 %v809_v17  ;;  %939 = vmatmul.bf16.vlgmr.msra.gmra.mxu0 %v809_v17  ;;  %v1074_v17 = vsel %vm554_vm0, %v1050_v14, 0 }
 0x1a5   : > { %1122 = vmatpush.bf16.msrb.mxu0 %v1074_v17 }
 0x1ab   : > { %v768_v12 = vpop.f32.mrf.mxu3 }
 0x1ac   : > { %v782_v25 = vadd.f32 %v781_v8, %v768_v12  ;;  %v1486_v8 = vor.u32 %v1598_v5, %v1483_v7  ;;  %v959_v12 = vmul.f32 0.5, %v2073_v16 }
 0x1ae   : > { %v786_v26 = vmul.f32 0.5, %v782_v25 }
 0x1b0   : > { %v2084_v29 = vadd.f32 %v788_v27, %v786_v26 }
 0x1b2   : > { %v810_v31 = vpack.c.bf16 %v2084_v29, %v2084_v29 }
 0x1b3   : > { %v770_v35 = vpop.f32.mrf.mxu3 }
 0x1b4   : > { %1477 = vmatmul.msk.bf16.vlgmr.msrb.gmra.mxu1 %vm550_vm8, %v810_v31 }
 0x1b5   : > { %1102 = vmatpush.bf16.msrb.mxu1 %v1542_v30 }
 0x1b9   : > { %1103 = vmatpush.bf16.msrb.mxu1 %v1534_v24 }
 0x1bd   : > { %1104 = vmatpush.bf16.msrb.mxu1 %v1526_v41 }
 0x1c1   : > { %1105 = vmatpush.bf16.msrb.mxu1 %v1518_v48 }
 0x1c4   : > { %1478 = vmatmul.msk.bf16.vlgmr.msra.gmra.mxu1 %vm550_vm8, %v810_v31  ;;  %v960_v31 = vmul.f32 0.5, %v2084_v29 }
 0x1c5   : > { %1106 = vmatpush.bf16.msrb.mxu1 %v1510_v54 }
 0x1c9   : > { %1107 = vmatpush.bf16.msrb.mxu1 %v1502_v60 }
 0x1cd   : > { %1108 = vmatpush.bf16.msrb.mxu1 %v1494_v2 }
 0x1d1   : > { %1109 = vmatpush.bf16.msrb.mxu1 %v1486_v8 }
 0x221   : > { %v940_v18 = vpop.f32.mrf.mxu0 }
 0x227   : > { %v914_v44 = vpop.f32.mrf.mxu2 }
 0x229   : > { %v942_v19 = vpop.f32.mrf.mxu0 }
 0x22f   : > { %v916_v20 = vpop.f32.mrf.mxu2 }
 0x231   : > { %v927_v21 = vpop.f32.mrf.mxu1 }
 0x232   : > { %v928_v22 = vadd.f32 %v927_v21, %v914_v44 }
 0x234   : > { %v957_v23 = vmul.f32 0.5, %v928_v22 }
 0x236   : > { %v961_v25 = vadd.f32 %v959_v12, %v957_v23 }
 0x238   : > { %v980_v26 = vpack.c.bf16 %v961_v25, %v961_v25  ;;  %v1130_v47 = vmul.f32 0.5, %v961_v25 }
 0x239   : > { %v929_v27 = vpop.f32.mrf.mxu1 }
 0x23a   : > { %1084 = vmatmul.bf16.vlgmr.msrb.gmra.mxu3 %v980_v26  ;;  %1110 = vmatmul.bf16.vlgmr.msrb.gmra.mxu1 %v980_v26 }
 0x241   : > { %v953_v28 = vpop.f32.mrf.mxu1 }
 0x242   : > { %v954_v33 = vadd.f32 %v953_v28, %v940_v18 }
 0x244   : > { %v958_v30 = vmul.f32 0.5, %v954_v33 }
 0x246   : > { %v962_v32 = vadd.f32 %v960_v31, %v958_v30 }
 0x248   : > { %v981_v34 = vpack.c.bf16 %v962_v32, %v962_v32  ;;  %v1131_v41 = vmul.f32 0.5, %v962_v32 }
 0x249   : > { %v955_v35 = vpop.f32.mrf.mxu1 }
 0x24a   : > { %1543 = vmatmul.msk.bf16.vlgmr.msrb.gmra.mxu2 %vm550_vm8, %v981_v34  ;;  %1544 = vmatmul.msk.bf16.vlgmr.msrb.gmra.mxu0 %vm550_vm8, %v981_v34 }
 0x2b7   : > { %v1111_v16 = vpop.f32.mrf.mxu1 }
 0x2bd   : > { %v1085_v24 = vpop.f32.mrf.mxu3 }
 0x2bf   : > { %v1113_v36 = vpop.f32.mrf.mxu1 }
 0x2c5   : > { %v1087_v37 = vpop.f32.mrf.mxu3 }
 0x2c7   : > { %v1124_v38 = vpop.f32.mrf.mxu0 }
 0x2c8   : > { %v1125_v39 = vadd.f32 %v1124_v38, %v1111_v16 }
 0x2ca   : > { %v1129_v40 = vmul.f32 0.5, %v1125_v39 }
 0x2cc   : > { %v1133_v42 = vadd.f32 %v1131_v41, %v1129_v40 }
 0x2cd   : > { %v1098_v29 = vpop.f32.mrf.mxu2 }
 0x2ce   : > { %v1099_v43 = vadd.f32 %v1098_v29, %v1085_v24  ;;  %1135 = vst.msk [vmem:[%s418_s4 + $0x8] sm:$0xff] %vm550_vm8, %v1133_v42 }
 0x2cf   : > { %v1126_v45 = vpop.f32.mrf.mxu0 }
 0x2d0   : > { %v1128_v46 = vmul.f32 0.5, %v1099_v43 }
 0x2d2   : > { %v1132_v48 = vadd.f32 %v1130_v47, %v1128_v46 }
 0x2d4   : > { %1134 = vst [vmem:[%s418_s4] sm:$0xff] %v1132_v48 }
 0x2d5   : > { %v1100_v49 = vpop.f32.mrf.mxu2 }
 0x2d6   : > { %1686 = shalt.err (!%p1683_p5)
}
 0x2d7   : > { %1618 = dma.vmem_to_hbm [thread:$0]  (%p1773_p6), %s1151_s5, 256, %s1153_s11, %s1137_s10  }
 0x2d8 PF: > { %s1164_s23 = sand.u32 1, %s1709_s6   ;;  %p1621_p7 = pnand %p1220_p9, %p1777_p8 }
 0x2d9   : > { %s1165_s24 = scalar_lea.sflag [#allocation4], %s1164_s23 }
 0x2da   : > { %p1622_p10 = pneg %p1621_p7 }
 0x2dc   : > { %1704 = dma.done.wait (%p1622_p10), %s1165_s24, 256  }
 0x2dd   : > { %1706 = vsyncadd (%p1622_p10), %s1165_s24, 4294967040  ;;  %p11_p11 = scmp.ge.s32.totalorder %s1758_s12, 4   ;;  %s2165_s6 = smov %s1713_s7 }
 0x2de   : > { %s2166_s7 = smov %s1717_s8  ;;  %s2167_s8 = smov %s1771_s15 }
 0x2df   : > { %s2168_s9 = smov %s1758_s12  ;;  %13 = sbr.rel (!%p11_p11) target bundleno = 3 (0x3), region = 105 }
 0x2e4   :  { %1171 = vsyncpa [#allocation4], 1 }
 0x2e5   :  { %1173 = vsyncpa [#allocation4 + $0x1], 1 }

</bundles_post_ra>
